<compile_context>
chip_gen: v7x
topology: tpu7x:2x2x1
jax: 0.10.0
libtpu: 0.0.40
codegen_flags: <defaults>
</compile_context>

<pallas_src>
from functools import partial

import jax
import jax.numpy as jnp
from jax import lax
from jax.experimental import pallas as pl
from jax.experimental.pallas import tpu as pltpu


_LANE = 128
_WIDE_TILE_BYTES = 2 * 1024 * 1024       # target logits-tile size (native dtype)
_WIDE_MAX_ROWS = 8192
_BIN_MAX_ROWS = 2048                     # 2048 * 128 = 262144 samples per binary tile
_VMEM_LIMIT = 48 * 1024 * 1024           # < 64 MiB physical on v7x, > 16/32 MiB defaults


def _round_up(x, m):
    return ((x + m - 1) // m) * m


def _focal_weight(one_minus_pt, gamma):
    """(1 - pt)**gamma. Small integer gammas unrolled; otherwise exp(g*log(x)) w/ 0-guard."""
    g = float(gamma)
    gi = int(round(g))
    if abs(g - gi) < 1e-12 and 0 <= gi <= 8:
        w = jnp.ones_like(one_minus_pt)
        for _ in range(gi):
            w = w * one_minus_pt
        return w
    safe = jnp.maximum(one_minus_pt, 1e-30)
    return jnp.where(one_minus_pt > 0.0,
                     jnp.exp(jnp.float32(g) * jnp.log(safe)),
                     jnp.zeros_like(one_minus_pt))


# --------------------------------------------------------------------------------------
# Wide path: general C. One grid step = (tile_n, C) logits block + (tile_n, 1) x_t / at.
# --------------------------------------------------------------------------------------
def _focal_kernel_wide(logits_ref, xt_ref, at_ref, out_ref, *, gamma):
    x = logits_ref[...].astype(jnp.float32)                 # (T, C)
    m = jnp.max(x, axis=-1, keepdims=True)                   # (T, 1)
    s = jnp.sum(jnp.exp(x - m), axis=-1, keepdims=True)      # (T, 1)

    xt = xt_ref[...]                                          # (T, 1) f32, gathered in wrapper
    at = at_ref[...]                                          # (T, 1) f32 (0 on padded rows)

    ce = (jnp.log(s) + m) - xt                                # = logsumexp - x_t >= 0
    pt = jnp.exp(-ce)
    one_minus_pt = jnp.maximum(1.0 - pt, 0.0)                 # guard pow(neg) from rounding
    focal = _focal_weight(one_minus_pt, gamma) * (at * ce)    # (T, 1)

    # Per-tile partial sum (un-normalized); each tile owns its own output block.
    out_ref[...] = jnp.broadcast_to(jnp.sum(focal), out_ref.shape)


def _focal_loss_wide(logits, targets, at, gamma, n, c):
    # x_t and alpha gathers hoisted to the wrapper (4 B/row vs >= C bytes/row of logits).
    xt = jnp.take_along_axis(logits, targets[:, None], axis=-1).astype(jnp.float32)  # (n, 1)
    if at is None:
        at = jnp.ones((n,), jnp.float32)

    itemsize = jnp.dtype(logits.dtype).itemsize
    row_align = max(8, 32 // itemsize)                     # 8 f32, 16 bf16, 32 int8
    tile_cap = _WIDE_TILE_BYTES // max(1, c * itemsize)
    tile_cap = max(row_align, min(tile_cap, _WIDE_MAX_ROWS))
    tile_cap = max(row_align, (tile_cap // row_align) * row_align)

    num_tiles = pl.cdiv(n, tile_cap)
    tile_n = _round_up(pl.cdiv(n, num_tiles), row_align)   # rebalance -> tiny padding
    n_pad = num_tiles * tile_n
    pad = n_pad - n
    if pad:
        # Padded rows have at == 0 -> contribute exactly 0; mean divides by true n.
        logits = jnp.pad(logits, ((0, pad), (0, 0)))
        xt = jnp.pad(xt, ((0, pad), (0, 0)))
        at = jnp.pad(at, (0, pad))
    at_col = at.reshape(n_pad, 1)

    partials = pl.pallas_call(
        partial(_focal_kernel_wide, gamma=float(gamma)),
        out_shape=jax.ShapeDtypeStruct((num_tiles, 8, _LANE), jnp.float32),
        grid=(num_tiles,),
        in_specs=[
            pl.BlockSpec((tile_n, c), lambda i: (i, 0)),
            pl.BlockSpec((tile_n, 1), lambda i: (i, 0)),
            pl.BlockSpec((tile_n, 1), lambda i: (i, 0)),
        ],
        out_specs=pl.BlockSpec((1, 8, _LANE), lambda i: (i, 0, 0)),
        compiler_params=pltpu.CompilerParams(
            dimension_semantics=("parallel",),          # per-tile outputs -> megacore OK
            vmem_limit_bytes=_VMEM_LIMIT,
        ),
    )(logits, xt, at_col)
    return jnp.sum(partials[:, 0, 0]) / n


# --------------------------------------------------------------------------------------
# Binary path (C == 2, the module's configuration): closed-form focal loss on a fully
# lane-dense (rows, 128) layout. No transpose, no cross-lane reductions.
#   z  = x_t - x_other ; ce = softplus(-z) ; pt = exp(-ce)
# --------------------------------------------------------------------------------------
def _binary_focal(z, gamma):
    ce = jnp.maximum(-z, 0.0) + jnp.log(1.0 + jnp.exp(-jnp.abs(z)))   # stable softplus(-z)
    pt = jnp.exp(-ce)
    one_minus_pt = jnp.maximum(1.0 - pt, 0.0)
    return _focal_weight(one_minus_pt, gamma) * ce


def _binary_kernel_alpha(z_ref, at_ref, out_ref, *, gamma):
    f = _binary_focal(z_ref[...], gamma) * at_ref[...]        # at == 0 masks padded samples
    out_ref[...] = jnp.broadcast_to(jnp.sum(f), out_ref.shape)


def _binary_kernel_noalpha(z_ref, out_ref, *, gamma, n_valid):
    z = z_ref[...]
    f = _binary_focal(z, gamma)
    rows, lanes = z.shape
    row_i = lax.broadcasted_iota(jnp.int32, z.shape, 0)
    lane_i = lax.broadcasted_iota(jnp.int32, z.shape, 1)
    gidx = pl.program_id(0) * (rows * lanes) + row_i * lanes + lane_i
    f = jnp.where(gidx < n_valid, f, 0.0)                     # mask padded samples by index
    out_ref[...] = jnp.broadcast_to(jnp.sum(f), out_ref.shape)


def _focal_loss_binary(logits, targets, at, gamma, n):
    x = logits.astype(jnp.float32)
    sign = 1.0 - 2.0 * targets.astype(jnp.float32)            # +1 if t==0 else -1
    z = sign * (x[:, 0] - x[:, 1])                            # x_t - x_other, fused in XLA

    rows_needed = pl.cdiv(n, _LANE)
    num_tiles = pl.cdiv(rows_needed, _BIN_MAX_ROWS)
    rows_per_tile = _round_up(pl.cdiv(rows_needed, num_tiles), 8)
    rows_pad = num_tiles * rows_per_tile
    n_pad = rows_pad * _LANE

    z = jnp.pad(z, (0, n_pad - n)).reshape(rows_pad, _LANE)

    inputs = [z]
    in_specs = [pl.BlockSpec((rows_per_tile, _LANE), lambda i: (i, 0))]
    if at is not None:
        at_p = jnp.pad(at, (0, n_pad - n)).reshape(rows_pad, _LANE)
        inputs.append(at_p)
        in_specs.append(pl.BlockSpec((rows_per_tile, _LANE), lambda i: (i, 0)))
        kernel = partial(_binary_kernel_alpha, gamma=float(gamma))
    else:
        # alpha is None: don't stream an `at` ones-vector at all.
        kernel = partial(_binary_kernel_noalpha, gamma=float(gamma), n_valid=n)

    partials = pl.pallas_call(
        kernel,
        out_shape=jax.ShapeDtypeStruct((num_tiles, 8, _LANE), jnp.float32),
        grid=(num_tiles,),
        in_specs=in_specs,
        out_specs=pl.BlockSpec((1, 8, _LANE), lambda i: (i, 0, 0)),
        compiler_params=pltpu.CompilerParams(
            dimension_semantics=("parallel",),
            vmem_limit_bytes=_VMEM_LIMIT,
        ),
    )(*inputs)
    return jnp.sum(partials[:, 0, 0]) / n


# --------------------------------------------------------------------------------------
# Public entry point (reduction='mean', matching the module's default/usage).
# --------------------------------------------------------------------------------------
def focal_loss(logits, targets, alpha=None, gamma=2.0):
    n, c = logits.shape
    targets = targets.astype(jnp.int32)
    at = alpha.astype(jnp.float32)[targets] if alpha is not None else None
    if c == 2:
        return _focal_loss_binary(logits, targets, at, gamma, n)
    return _focal_loss_wide(logits, targets, at, gamma, n, c)


def focal_loss_ref(logits, targets, alpha=None, gamma=2.0):
    """Pure-JAX reference (matches the PyTorch module with reduction='mean')."""
    logits = logits.astype(jnp.float32)
    logp = jax.nn.log_softmax(logits, axis=-1)
    ce = -jnp.take_along_axis(logp, targets[:, None].astype(jnp.int32), axis=-1)[:, 0]
    pt = jnp.exp(-ce)
    if alpha is not None:
        ce = alpha.astype(jnp.float32)[targets] * ce
    focal = (1.0 - pt) ** gamma * ce
    return jnp.mean(focal)


if __name__ == "__main__":
    key = jax.random.PRNGKey(0)
    k1, k2, k3, k4, k5, k6 = jax.random.split(key, 6)

    # Case 1: the module's configuration — C=2, alpha=[1.0, 1.2], gamma=2 (binary path).
    N, C = 8, 2
    logits = jax.random.normal(k1, (N, C), dtype=jnp.float32)
    targets = jax.random.randint(k2, (N,), 0, C, dtype=jnp.int32)
    alpha = jnp.array([1.0, 1.2], dtype=jnp.float32)
    out = jax.block_until_ready(focal_loss(logits, targets, alpha, gamma=2.0))
    ref = focal_loss_ref(logits, targets, alpha, gamma=2.0)
    assert jnp.allclose(out, ref, atol=1e-5, rtol=1e-5), (out, ref)

    # Case 2: binary path, ragged N (padding + index mask), no alpha, non-integer gamma.
    N2, C2 = 5000, 2
    logits2 = jax.random.normal(k3, (N2, C2), dtype=jnp.float32)
    targets2 = jax.random.randint(k4, (N2,), 0, C2, dtype=jnp.int32)
    out2 = jax.block_until_ready(focal_loss(logits2, targets2, None, gamma=1.5))
    ref2 = focal_loss_ref(logits2, targets2, None, gamma=1.5)
    assert jnp.allclose(out2, ref2, atol=1e-5, rtol=2e-4), (out2, ref2)

    # Case 3: wide path, bf16 logits, multi-tile "parallel" grid with per-tile partials.
    N3, C3 = 6000, 256
    logits3 = jax.random.normal(k5, (N3, C3), dtype=jnp.bfloat16)
    targets3 = jax.random.randint(k6, (N3,), 0, C3, dtype=jnp.int32)
    alpha3 = jax.random.uniform(k2, (C3,), minval=0.5, maxval=1.5, dtype=jnp.float32)
    out3 = jax.block_until_ready(focal_loss(logits3, targets3, alpha3, gamma=2.0))
    ref3 = focal_loss_ref(logits3, targets3, alpha3, gamma=2.0)
    assert jnp.allclose(out3, ref3, atol=1e-5, rtol=2e-4), (out3, ref3)

    print("KERNEL_OK")
</pallas_src>

<mosaic_0001>
module attributes {stable_mosaic.version = 11 : i64} {
  func.func @_binary_kernel_alpha(%arg0: i32, %arg1: memref<8x128xf32, #tpu.memory_space<vmem>>, %arg2: memref<8x128xf32, #tpu.memory_space<vmem>>, %arg3: memref<1x8x128xf32, #tpu.memory_space<vmem>>) attributes {dimension_semantics = [#tpu.dimension_semantics<parallel>], iteration_bounds = array<i64: 1>, scalar_prefetch = 0 : i64, scratch_operands = 0 : i64, tpu.core_type = #tpu.core_type<tc>, window_params = [{transform_indices = @transform_0, window_bounds = array<i64: 8, 128>}, {transform_indices = @transform_1, window_bounds = array<i64: 8, 128>}, {transform_indices = @transform_2, window_bounds = array<i64: 1, 8, 128>}]} {
    %c0 = arith.constant 0 : index
    %c0_0 = arith.constant 0 : index
    %0 = vector.load %arg1[%c0, %c0_0] : memref<8x128xf32, #tpu.memory_space<vmem>>, vector<8x128xf32>
    %cst = arith.constant 0.000000e+00 : f32
    %1 = vector.broadcast %cst : f32 to vector<8x128xf32>
    %2 = arith.subf %1, %0 : vector<8x128xf32>
    %cst_1 = arith.constant 0.000000e+00 : f32
    %3 = vector.broadcast %cst_1 : f32 to vector<8x128xf32>
    %4 = arith.maximumf %2, %3 : vector<8x128xf32>
    %5 = math.absf %0 : vector<8x128xf32>
    %cst_2 = arith.constant 0.000000e+00 : f32
    %6 = vector.broadcast %cst_2 : f32 to vector<8x128xf32>
    %7 = arith.subf %6, %5 : vector<8x128xf32>
    %8 = math.exp %7 : vector<8x128xf32>
    %cst_3 = arith.constant 1.000000e+00 : f32
    %9 = vector.broadcast %cst_3 : f32 to vector<8x128xf32>
    %10 = arith.addf %9, %8 : vector<8x128xf32>
    %11 = math.log %10 : vector<8x128xf32>
    %12 = arith.addf %4, %11 : vector<8x128xf32>
    %cst_4 = arith.constant 0.000000e+00 : f32
    %13 = vector.broadcast %cst_4 : f32 to vector<8x128xf32>
    %14 = arith.subf %13, %12 : vector<8x128xf32>
    %15 = math.exp %14 : vector<8x128xf32>
    %cst_5 = arith.constant 1.000000e+00 : f32
    %16 = vector.broadcast %cst_5 : f32 to vector<8x128xf32>
    %17 = arith.subf %16, %15 : vector<8x128xf32>
    %cst_6 = arith.constant 0.000000e+00 : f32
    %18 = vector.broadcast %cst_6 : f32 to vector<8x128xf32>
    %19 = arith.maximumf %17, %18 : vector<8x128xf32>
    %cst_7 = arith.constant 1.000000e+00 : f32
    %20 = vector.broadcast %cst_7 : f32 to vector<8x128xf32>
    %21 = arith.mulf %20, %19 : vector<8x128xf32>
    %22 = arith.mulf %21, %19 : vector<8x128xf32>
    %23 = arith.mulf %22, %12 : vector<8x128xf32>
    %c0_8 = arith.constant 0 : index
    %c0_9 = arith.constant 0 : index
    %24 = vector.load %arg2[%c0_8, %c0_9] : memref<8x128xf32, #tpu.memory_space<vmem>>, vector<8x128xf32>
    %25 = arith.mulf %23, %24 : vector<8x128xf32>
    %26 = vector.shape_cast %25 : vector<8x128xf32> to vector<1x8x128xf32>
    %cst_10 = arith.constant dense<0.000000e+00> : vector<1xf32>
    %27 = vector.multi_reduction <add>, %26, %cst_10 [1, 2] : vector<1x8x128xf32> to vector<1xf32>
    %28 = vector.shape_cast %27 : vector<1xf32> to vector<1x1x1xf32>
    %29 = vector.extract %28[0, 0, 0] : f32 from vector<1x1x1xf32>
    %30 = vector.broadcast %29 : f32 to vector<1x8x128xf32>
    %c0_11 = arith.constant 0 : index
    %c0_12 = arith.constant 0 : index
    %c0_13 = arith.constant 0 : index
    %31 = vector.load %arg3[%c0_11, %c0_12, %c0_13] : memref<1x8x128xf32, #tpu.memory_space<vmem>>, vector<1x8x128xf32>
    tpu.vector_store %arg3[%c0_11, %c0_12, %c0_13], %30 {strides = array<i32>} : memref<1x8x128xf32, #tpu.memory_space<vmem>>, vector<1x8x128xf32>,
    return
  }
  func.func @transform_0(%arg0: i32) -> (i32, i32) {
    %c0_i32 = arith.constant 0 : i32
    %c0_i32_0 = arith.constant 0 : i32
    return %arg0, %c0_i32 : i32, i32
  }
  func.func @transform_1(%arg0: i32) -> (i32, i32) {
    %c0_i32 = arith.constant 0 : i32
    %c0_i32_0 = arith.constant 0 : i32
    return %arg0, %c0_i32 : i32, i32
  }
  func.func @transform_2(%arg0: i32) -> (i32, i32, i32) {
    %c0_i32 = arith.constant 0 : i32
    %c0_i32_0 = arith.constant 0 : i32
    %c0_i32_1 = arith.constant 0 : i32
    return %arg0, %c0_i32, %c0_i32_0 : i32, i32, i32
  }
}

</mosaic_0001>

<bundles_post_ra>
// kernel: tpu_custom_call.1
= control target key start
LH: loop header
LB: loop body
LE: loop exit
PB: predicated region body
PF: predicated region fallthrough
CT: control target
= control target key end

     0   :  { %7 = vsyncpa [#allocation3], 0  ;;  %s220_s0 = inlined_call_operand.hbm [shape: f32[8,128], index: 0, kind: input, shape index: {}]   ;;  %s221_s1 = inlined_call_operand.hbm [shape: f32[8,128], index: 1, kind: input, shape index: {}]   ;;  %s222_s2 = inlined_call_operand.hbm [shape: f32[1,8,128], index: 2, kind: output, shape index: {}]  }
   0x1   :  { %8 = vsyncpa [#allocation6], 0 }
   0x2   :  { %9 = vsyncpa [#allocation4], 0  ;;  %s166_s9 = smov [#allocation2]   ;;  %s167_s11 = smov [#allocation5]  }
   0x3   :  { %s16_s10 = sshll.u32 %s166_s9, 4  ;;  %s26_s12 = sshll.u32 %s167_s11, 4  ;;  %s17_s10 = int_to_ptr.vmem [resolvable:$true] %s16_s10  ;;  %s27_s12 = int_to_ptr.vmem [resolvable:$true] %s26_s12 }
   0x4   :  { %s94_s15 = scalar_lea.hbm %s220_s0, 128 }
   0x5   :  { %p95_p0 = scmp.ne.s32.totalorder %s220_s0, %s94_s15  ;;  %p98_p1 = scmp.lt.u32.totalorder %s94_s15, %s220_s0 }
   0x7   :  { %p100_p2 = pnand %p98_p1, %p95_p0 }
   0x9   :  { %103 = shalt.err (!%p100_p2)
}
   0xa   :  { %s104_s20 = scalar_lea.vmem %s17_s10, 128  ;;  %p109_p4 = scmp.lt.s32.totalorder %s17_s10, %s17_s10 }
   0xb   :  { %p105_p3 = scmp.ne.s32.totalorder %s17_s10, %s104_s20  ;;  %p110_p5 = scmp.lt.s32.totalorder %s104_s20, %s104_s20 }
   0xd   :  { %p111_p6 = por %p110_p5, %p109_p4 }
   0xf   :  { %p112_p7 = pnand %p111_p6, %p105_p3 }
  0x11   :  { %115 = shalt.err (!%p112_p7)
}
  0x12   :  { %19 = dma.hbm_to_vmem [thread:$0]  %s220_s0, 128, %s17_s10, [#allocation3]  }
  0x13   :  { %s116_s25 = scalar_lea.hbm %s221_s1, 128 }
  0x14   :  { %p117_p8 = scmp.ne.s32.totalorder %s221_s1, %s116_s25  ;;  %p120_p9 = scmp.lt.u32.totalorder %s116_s25, %s221_s1 }
  0x16   :  { %p122_p10 = pnand %p120_p9, %p117_p8 }
  0x18   :  { %125 = shalt.err (!%p122_p10)
}
  0x19   :  { %s126_s30 = scalar_lea.vmem %s27_s12, 128  ;;  %p131_p12 = scmp.lt.s32.totalorder %s27_s12, %s27_s12 }
  0x1a   :  { %p127_p11 = scmp.ne.s32.totalorder %s27_s12, %s126_s30  ;;  %p132_p13 = scmp.lt.s32.totalorder %s126_s30, %s126_s30 }
  0x1c   :  { %p133_p0 = por %p132_p13, %p131_p12 }
  0x1e   :  { %p134_p1 = pnand %p133_p0, %p127_p11 }
  0x20   :  { %137 = shalt.err (!%p134_p1)
}
  0x21   :  { %29 = dma.hbm_to_vmem [thread:$0]  %s221_s1, 128, %s27_s12, [#allocation6]  }
  0x22   :  { %160 = dma.done.wait [#allocation3], 128  }
  0x23   :  { %161 = vsyncadd [#allocation3], 4294967168 }
  0x24   :  { %162 = dma.done.wait [#allocation6], 128  }
  0x25   :  { %163 = vsyncadd [#allocation6], 4294967168  ;;  %v36_v0 = vld [vmem:[#allocation2] sm:$0xff]  ;;  %v54_v17 = vld [vmem:[#allocation5] sm:$0xff]  ;;  %s168_s1 = smov [#allocation7]  }
  0x26   :  { %v39_v1 = vand.u32 2147483647, %v36_v0  ;;  %v37_v6 = vsub.f32 0.0, %v36_v0  ;;  %s73_s4 = sshll.u32 %s168_s1, 4  ;;  %s74_s4 = int_to_ptr.vmem [resolvable:$true] %s73_s4 }
  0x27   :  { %s138_s6 = scalar_lea.vmem %s74_s4, 128  ;;  %p143_p3 = scmp.lt.s32.totalorder %s74_s4, %s74_s4 }
  0x28   :  { %v40_v2 = vsub.f32 0.0, %v39_v1  ;;  %v38_v7 = vmax.f32 %v37_v6, 0.0  ;;  %p139_p2 = scmp.ne.s32.totalorder %s74_s4, %s138_s6  ;;  %p144_p4 = scmp.lt.s32.totalorder %s138_s6, %s138_s6 }
  0x2a   :  { %v41_v3 = vmul.f32 1.442695, %v40_v2  ;;  %p145_p5 = por %p144_p4, %p143_p3 }
  0x2c   :  { %88 = vpow2.f32 %v41_v3  ;;  %p146_p6 = pnand %p145_p5, %p139_p2 }
  0x36   :  { %v89_v4 = vpop.eup %88 }
  0x37   :  { %v43_v5 = vadd.f32 1.0, %v89_v4 }
  0x39   :  { %90 = vlog2.f32 %v43_v5 }
  0x43   :  { %v91_v8 = vpop.eup %90 }
  0x44   :  { %v45_v9 = vmul.f32 0.6931472, %v91_v8 }
  0x46   :  { %v46_v10 = vadd.f32 %v45_v9, %v38_v7 }
  0x48   :  { %v47_v11 = vsub.f32 0.0, %v46_v10 }
  0x4a   :  { %v48_v12 = vmul.f32 1.442695, %v47_v11 }
  0x4c   :  { %92 = vpow2.f32 %v48_v12 }
  0x56   :  { %v93_v13 = vpop.eup %92 }
  0x57   :  { %v50_v14 = vsub.f32 1.0, %v93_v13 }
  0x59   :  { %v51_v15 = vmax.f32 %v50_v14, 0.0 }
  0x5b   :  { %v52_v16 = vmul.f32 %v51_v15, %v51_v15 }
  0x5d   :  { %v53_v18 = vmul.f32 %v52_v16, %v46_v10 }
  0x5f   :  { %v55_v19 = vmul.f32 %v54_v17, %v53_v18 }
  0x61   :  { %56 = vadd.xlane.f32.xlu0 %v55_v19 }
  0xee   :  { %v57_v20 = vpop.xlane.xlu0 %56 }
  0xef   :  { %v58_v21 = vrot.slane %v57_v20, 4 }
  0xf1   :  { %v59_v22 = vadd.f32 %v58_v21, %v57_v20 }
  0xf3   :  { %v60_v23 = vrot.slane %v59_v22, 2 }
  0xf5   :  { %v61_v24 = vadd.f32 %v60_v23, %v59_v22 }
  0xf7   :  { %v62_v25 = vrot.slane %v61_v24, 1 }
  0xf9   :  { %v63_v26 = vadd.f32 %v62_v25, %v61_v24 }
  0xfb   :  { %83 = vpush %v63_v26 }
 0x12c   :  { %s84_s5 = spop %83 }
 0x12d   :  { %v65_v27 = vstv %s84_s5 }
 0x12e   :  { %66 = vst [vmem:[#allocation7] sm:$0xff] %v65_v27 }
 0x12f   :  { %149 = shalt.err (!%p146_p6)
}
 0x130   :  { %s150_s9 = scalar_lea.hbm %s222_s2, 128 }
 0x131   :  { %p151_p7 = scmp.ne.s32.totalorder %s222_s2, %s150_s9  ;;  %p154_p8 = scmp.lt.u32.totalorder %s150_s9, %s222_s2 }
 0x133   :  { %p156_p9 = pnand %p154_p8, %p151_p7 }
 0x135   :  { %159 = shalt.err (!%p156_p9)
}
 0x136   :  { %76 = dma.vmem_to_hbm [thread:$0]  %s74_s4, 128, %s222_s2, [#allocation4]  }
 0x137   :  { %164 = dma.done.wait [#allocation4], 128  }
 0x138   :  { %165 = vsyncadd [#allocation4], 4294967168 }
 0x139   :  { %80 = vsyncpa [#allocation3], 1 }
 0x13a   :  { %81 = vsyncpa [#allocation6], 1 }
 0x13b   :  { %82 = vsyncpa [#allocation4], 1 }

</bundles_post_ra>
